<compile_context>
chip_gen: v5e
topology: v5e:2x2
jax: 0.10.0
libtpu: 0.0.40
codegen_flags: <defaults>
</compile_context>

<pallas_src>
import functools

import jax
import jax.numpy as jnp
from jax.experimental import pallas as pl
from jax.experimental.pallas import tpu as pltpu


# ---------------------------------------------------------------------------
# Kernel
# ---------------------------------------------------------------------------
def _pmffm_kernel(x1_ref, x2_ref, ws_ref, bs_ref, wd_ref, bd_ref, o_ref,
                  *, k, m, mp, cg, bt):
    mh = m // 2
    kmp = k * mp

    # Weights / biases loaded (and cast) once per grid step -- hoisted out of
    # all loops below.
    ws = ws_ref[...].astype(jnp.float32)            # [k*mp + k*mh*cg, C]
    bs = bs_ref[...].astype(jnp.float32)            # [k*mp + k*mh*cg, 1]
    wd = wd_ref[...].astype(jnp.float32)            # [k*mh*cg, C]
    bd = bd_ref[...].astype(jnp.float32)            # [k*mh*cg, 1]

    # Static unroll over the small batch sub-block (bt <= 8).
    for b in range(bt):
        x1 = x1_ref[b, :, :].astype(jnp.float32)    # [C, P] pixels on lanes
        x2 = x2_ref[b, :, :].astype(jnp.float32)    # [C, P]
        s = x1 + x2                                 # d_j for j <  m/2
        dd = x1 - x2                                # +-d_j for j >= m/2 (sign in W_d)

        # Two fused MXU matmuls (lane-dense outputs):
        #   A[:k*mp]  per-group prob logits, padded to mp(=8) sublanes / group
        #   A[k*mp:]  branch convs with d_j = x1+x2
        #   rd        branch convs with d_j = +-(x1-x2)
        A = jnp.dot(ws, s, preferred_element_type=jnp.float32) + bs
        rd = jnp.dot(wd, dd, preferred_element_type=jnp.float32) + bd

        for g in range(k):
            # Softmax over the m branch logits of group g as full-tile ops:
            # padded logit rows carry bias -1e9 so their exp() is exactly 0.
            lg = A[g * mp:(g + 1) * mp, :]                   # [mp, P] (aligned)
            lmax = jnp.max(lg, axis=0, keepdims=True)        # [1, P]  (XLU)
            e = jnp.exp(lg - lmax)                           # [mp, P] (EUP)
            denom = jnp.sum(e, axis=0, keepdims=True)        # [1, P]  (XLU)
            probs = e * pl.reciprocal(denom, approx=False)   # [mp, P]

            # Weighted sum of the m branch-conv outputs.  Each prob row is
            # used exactly once, so each [1,P]->[cg,P] broadcast happens once.
            r0 = kmp + g * mh * cg
            acc = probs[0:1, :] * A[r0:r0 + cg, :]
            for j in range(1, mh):                           # branches on s
                r0 = kmp + (g * mh + j) * cg
                acc = acc + probs[j:j + 1, :] * A[r0:r0 + cg, :]
            for jj in range(mh):                             # branches on +-dd
                j = mh + jj
                r0 = (g * mh + jj) * cg
                acc = acc + probs[j:j + 1, :] * rd[r0:r0 + cg, :]

            # Direct per-group store (cg multiple of 8 -> sublane aligned);
            # no final concatenate copy.
            o_ref[b, g * cg:(g + 1) * cg, :] = acc.astype(o_ref.dtype)


# ---------------------------------------------------------------------------
# Weight packing (block-diagonal fused weights, logits padded to 8 sublanes)
# ---------------------------------------------------------------------------
def _pack_weights(wp, bp, wc, bc, *, k, m, cg, C):
    mh, mq = m // 2, m // 4
    mp = ((m + 7) // 8) * 8           # pad each group's logit rows to a sublane tile
    # sign of (x1 - x2) for branches j >= m/2 (from d1line/d2line):
    #   j in [m/2, m/2+m/4): d = +dd ; j in [m/2+m/4, m): d = -dd
    dd_signs = [1.0] * mq + [-1.0] * mq

    wp_block = jnp.zeros((k * mp, C), jnp.float32)
    bp_block = jnp.full((k * mp, 1), -1e9, jnp.float32)   # pad rows: exp() == 0
    for g in range(k):
        wp_block = wp_block.at[g * mp:g * mp + m, g * cg:(g + 1) * cg].set(wp)
        bp_block = bp_block.at[g * mp:g * mp + m, 0].set(bp)

    wcs_block = jnp.zeros((k * mh * cg, C), jnp.float32)
    wcd_block = jnp.zeros((k * mh * cg, C), jnp.float32)
    for g in range(k):
        for j in range(mh):
            r0 = (g * mh + j) * cg
            wcs_block = wcs_block.at[r0:r0 + cg, g * cg:(g + 1) * cg].set(wc[j])
        for jj in range(mh):
            j = mh + jj
            r0 = (g * mh + jj) * cg
            wcd_block = wcd_block.at[r0:r0 + cg, g * cg:(g + 1) * cg].set(
                dd_signs[jj] * wc[j])
    bcs = jnp.tile(bc[:mh].reshape(mh * cg), (k,)).reshape(k * mh * cg, 1)
    bcd = jnp.tile(bc[mh:].reshape(mh * cg), (k,)).reshape(k * mh * cg, 1)

    w_s = jnp.concatenate([wp_block, wcs_block], axis=0)   # [k*mp + k*mh*cg, C]
    b_s = jnp.concatenate([bp_block, bcs], axis=0)
    return (w_s.astype(jnp.float32), b_s.astype(jnp.float32),
            wcd_block.astype(jnp.float32), bcd.astype(jnp.float32), mp)


# ---------------------------------------------------------------------------
# Tiling / VMEM configuration
# ---------------------------------------------------------------------------
def _tpu_vmem_capacity_bytes():
    """Physical VMEM per TensorCore; conservative fallback if undetectable."""
    try:
        info = pltpu.get_tpu_info()
        cap = getattr(info, "vmem_capacity_bytes", None)
        if cap:
            return int(cap)
    except Exception:
        pass
    return 64 << 20          # v7x per-TC size -- safe lower bound


def _tile_config():
    """(pixel-tile cap, vmem_limit_bytes) chosen per TPU generation."""
    cap = _tpu_vmem_capacity_bytes()
    if cap >= (100 << 20):              # v5e / v6e: 128 MiB physical VMEM
        return 32768, 96 << 20
    return 16384, 48 << 20              # v7x: 64 MiB physical per TC


def _round_up(x, mult):
    return -(-x // mult) * mult


def _plan_pixel_tiling(HW, cap, tile_pixels):
    """Returns (padded_HW, tile_p, n_p). tile_p is always a multiple of 128."""
    if tile_pixels is not None:
        if tile_pixels % 128 != 0:
            raise ValueError("tile_pixels must be a multiple of 128 (lane width)")
        tile_p = min(tile_pixels, _round_up(HW, 128))
        hwp = _round_up(HW, tile_p)
        return hwp, tile_p, hwp // tile_p
    hwp = _round_up(HW, 128)
    if hwp <= cap:
        return hwp, hwp, 1
    n_p = -(-hwp // cap)
    tile_p = _round_up(-(-hwp // n_p), 128)
    return n_p * tile_p, tile_p, n_p


def _choose_batch_tile(B, C, tile_p, n_p, max_bt=8):
    """Batch sub-block per grid step: amortize per-step overhead when HW is
    small, while keeping >= 2 grid steps so megacore can split the work."""
    per_b_bytes = 2 * C * tile_p * 4                      # both inputs, fp32
    bt = max(1, min(B, max_bt, (2 << 20) // max(per_b_bytes, 1)))
    if n_p == 1 and B >= 2:
        bt = min(bt, max(1, B // 2))                      # keep >= 2 grid steps
    while B % bt != 0:
        bt -= 1
    return max(bt, 1)


# ---------------------------------------------------------------------------
# Wrapper
# ---------------------------------------------------------------------------
@functools.partial(jax.jit, static_argnames=("k", "m", "tile_pixels"))
def pmffm_pallas(x1, x2, wp, bp, wc, bc, *, k, m, tile_pixels=None):
    """x1, x2: NCHW float32.  Returns NCHW float32 (PMFFM forward)."""
    B, C, H, W = x1.shape
    assert C % k == 0 and m % 4 == 0, "PMFFM requires C % k == 0 and m % 4 == 0"
    cg = C // k
    HW = H * W

    cap, vmem_limit = _tile_config()
    hwp, tile_p, n_p = _plan_pixel_tiling(HW, cap, tile_pixels)
    bt = _choose_batch_tile(B, C, tile_p, n_p)

    # Free, layout-preserving reshapes; pad the pixel axis (zeros) so every
    # block is a multiple of 128 lanes -> unmasked stores.  Padding is sliced
    # off after the kernel.
    x1r = x1.reshape(B, C, HW)
    x2r = x2.reshape(B, C, HW)
    if hwp != HW:
        x1r = jnp.pad(x1r, ((0, 0), (0, 0), (0, hwp - HW)))
        x2r = jnp.pad(x2r, ((0, 0), (0, 0), (0, hwp - HW)))

    w_s, b_s, w_d, b_d, mp = _pack_weights(wp, bp, wc, bc, k=k, m=m, cg=cg, C=C)
    Rs, Rd = w_s.shape[0], w_d.shape[0]

    kernel = functools.partial(_pmffm_kernel, k=k, m=m, mp=mp, cg=cg, bt=bt)

    out = pl.pallas_call(
        kernel,
        out_shape=jax.ShapeDtypeStruct((B, C, hwp), x1.dtype),
        grid_spec=pltpu.PrefetchScalarGridSpec(
            num_scalar_prefetch=0,
            grid=(B // bt, n_p),
            in_specs=[
                pl.BlockSpec((bt, C, tile_p), lambda b, p: (b, 0, p)),   # x1
                pl.BlockSpec((bt, C, tile_p), lambda b, p: (b, 0, p)),   # x2
                pl.BlockSpec((Rs, C), lambda b, p: (0, 0)),              # W_s
                pl.BlockSpec((Rs, 1), lambda b, p: (0, 0)),              # b_s
                pl.BlockSpec((Rd, C), lambda b, p: (0, 0)),              # W_d
                pl.BlockSpec((Rd, 1), lambda b, p: (0, 0)),              # b_d
            ],
            out_specs=pl.BlockSpec((bt, C, tile_p), lambda b, p: (b, 0, p)),
        ),
        compiler_params=pltpu.CompilerParams(
            dimension_semantics=("parallel", "parallel"),
            vmem_limit_bytes=vmem_limit),
    )(x1r, x2r, w_s, b_s, w_d, b_d)

    if hwp != HW:
        out = out[:, :, :HW]
    return out.reshape(B, C, H, W)


# ---------------------------------------------------------------------------
# Pure-JAX reference (transcription of the PyTorch forward, NCHW)
# ---------------------------------------------------------------------------
def pmffm_reference(x1, x2, wp, bp, wc, bc, *, k, m):
    B, C, H, W = x1.shape
    cg = C // k
    hp = jax.lax.Precision.HIGHEST
    d1line = jnp.array([1.0] * (m // 2) + [1.0] * (m // 4) + [-1.0] * (m // 4),
                       dtype=jnp.float32).reshape(1, 1, m, 1, 1, 1)
    d2line = jnp.array([1.0] * (m // 2) + [-1.0] * (m // 4) + [1.0] * (m // 4),
                       dtype=jnp.float32).reshape(1, 1, m, 1, 1, 1)

    s = (x1 + x2).reshape(B, k, cg, H, W).transpose(0, 1, 3, 4, 2)   # [B,k,H,W,cg]
    logits = jnp.einsum('bkhwc,mc->bkhwm', s, wp, precision=hp) + bp
    prob = jax.nn.softmax(logits, axis=4)                            # [B,k,H,W,m]

    d1 = jnp.broadcast_to(x1.reshape(B, k, 1, cg, H, W), (B, k, m, cg, H, W))
    d2 = jnp.broadcast_to(x2.reshape(B, k, 1, cg, H, W), (B, k, m, cg, H, W))
    d = d1 * d1line + d2 * d2line                                    # [B,k,m,cg,H,W]

    result = (jnp.einsum('bkjihw,joi->bkjohw', d, wc, precision=hp)
              + bc.reshape(1, 1, m, cg, 1, 1))
    result = result.transpose(0, 1, 4, 5, 3, 2)                      # [B,k,H,W,cg,m]
    out = jnp.sum(result * prob[:, :, :, :, None, :], axis=5)        # [B,k,H,W,cg]
    return out.transpose(0, 1, 4, 2, 3).reshape(B, C, H, W)


if __name__ == "__main__":
    # Shapes consistent with the module: dim=C=16, k=2, m=4 -> cg=8
    B, C, H, W = 2, 16, 16, 16
    k, m = 2, 4
    cg = C // k

    key = jax.random.PRNGKey(0)
    k_x1, k_x2, k_wp, k_bp, k_wc, k_bc = jax.random.split(key, 6)

    x1 = jax.random.normal(k_x1, (B, C, H, W), dtype=jnp.float32)
    x2 = jax.random.normal(k_x2, (B, C, H, W), dtype=jnp.float32)

    # Parameters (shapes from the module __init__):
    #   Linear(dim//k, m): weight [m, cg], bias [m]
    #   Conv2d(cg*m, cg*m, 1, groups=m): weight -> [m, cg, cg], bias -> [m, cg]
    wp = jax.random.normal(k_wp, (m, cg), dtype=jnp.float32) * 0.2
    bp = jax.random.normal(k_bp, (m,), dtype=jnp.float32) * 0.1
    wc = jax.random.normal(k_wc, (m, cg, cg), dtype=jnp.float32) * 0.2
    bc = jax.random.normal(k_bc, (m, cg), dtype=jnp.float32) * 0.1

    ref = jax.block_until_ready(pmffm_reference(x1, x2, wp, bp, wc, bc, k=k, m=m))

    # Explicit 128-pixel tiles (lane-dense) -> grid has >= 2 steps.
    out_tiled = jax.block_until_ready(
        pmffm_pallas(x1, x2, wp, bp, wc, bc, k=k, m=m, tile_pixels=128))
    # Auto path: generation-aware tile cap + batch blocking.
    out_auto = jax.block_until_ready(
        pmffm_pallas(x1, x2, wp, bp, wc, bc, k=k, m=m))

    # Non-128-divisible spatial size exercises the pixel-axis padding path.
    Hs, Ws = 10, 10
    x1s = jax.random.normal(k_x1, (B, C, Hs, Ws), dtype=jnp.float32)
    x2s = jax.random.normal(k_x2, (B, C, Hs, Ws), dtype=jnp.float32)
    ref_s = jax.block_until_ready(
        pmffm_reference(x1s, x2s, wp, bp, wc, bc, k=k, m=m))
    out_s = jax.block_until_ready(
        pmffm_pallas(x1s, x2s, wp, bp, wc, bc, k=k, m=m))

    assert out_tiled.shape == (B, C, H, W)
    assert out_s.shape == (B, C, Hs, Ws)
    # Tolerance covers MXU multi-pass f32 matmul vs XLA einsum reduction-order
    # differences (the approx-reciprocal perturbation of the previous version
    # has been removed).
    assert jnp.allclose(out_tiled, ref, atol=1e-2, rtol=1e-2), (
        f"max abs err = {jnp.max(jnp.abs(out_tiled - ref))}")
    assert jnp.allclose(out_auto, ref, atol=1e-2, rtol=1e-2), (
        f"max abs err = {jnp.max(jnp.abs(out_auto - ref))}")
    assert jnp.allclose(out_s, ref_s, atol=1e-2, rtol=1e-2), (
        f"max abs err = {jnp.max(jnp.abs(out_s - ref_s))}")
    print("KERNEL_OK")
</pallas_src>

<mosaic_0001>
module attributes {stable_mosaic.version = 11 : i64} {
  func.func @_pmffm_kernel(%arg0: i32, %arg1: i32, %arg2: memref<2x16x128xf32, #tpu.memory_space<vmem>>, %arg3: memref<2x16x128xf32, #tpu.memory_space<vmem>>, %arg4: memref<48x16xf32, #tpu.memory_space<vmem>>, %arg5: memref<48x1xf32, #tpu.memory_space<vmem>>, %arg6: memref<32x16xf32, #tpu.memory_space<vmem>>, %arg7: memref<32x1xf32, #tpu.memory_space<vmem>>, %arg8: memref<2x16x128xf32, #tpu.memory_space<vmem>>) attributes {dimension_semantics = [#tpu.dimension_semantics<parallel>, #tpu.dimension_semantics<parallel>], iteration_bounds = array<i64: 1, 2>, scalar_prefetch = 0 : i64, scratch_operands = 0 : i64, tpu.core_type = #tpu.core_type<tc>, window_params = [{transform_indices = @transform_0, window_bounds = array<i64: 2, 16, 128>}, {transform_indices = @transform_1, window_bounds = array<i64: 2, 16, 128>}, {pipeline_mode = #tpu.pipeline_mode<synchronous>, transform_indices = @transform_2, window_bounds = array<i64: 48, 16>}, {pipeline_mode = #tpu.pipeline_mode<synchronous>, transform_indices = @transform_3, window_bounds = array<i64: 48, 1>}, {pipeline_mode = #tpu.pipeline_mode<synchronous>, transform_indices = @transform_4, window_bounds = array<i64: 32, 16>}, {pipeline_mode = #tpu.pipeline_mode<synchronous>, transform_indices = @transform_5, window_bounds = array<i64: 32, 1>}, {transform_indices = @transform_6, window_bounds = array<i64: 2, 16, 128>}]} {
    %c0 = arith.constant 0 : index
    %c0_0 = arith.constant 0 : index
    %0 = vector.load %arg4[%c0, %c0_0] : memref<48x16xf32, #tpu.memory_space<vmem>>, vector<48x16xf32>
    %c0_1 = arith.constant 0 : index
    %c0_2 = arith.constant 0 : index
    %1 = vector.load %arg5[%c0_1, %c0_2] : memref<48x1xf32, #tpu.memory_space<vmem>>, vector<48x1xf32>
    %c0_3 = arith.constant 0 : index
    %c0_4 = arith.constant 0 : index
    %2 = vector.load %arg6[%c0_3, %c0_4] : memref<32x16xf32, #tpu.memory_space<vmem>>, vector<32x16xf32>
    %c0_5 = arith.constant 0 : index
    %c0_6 = arith.constant 0 : index
    %3 = vector.load %arg7[%c0_5, %c0_6] : memref<32x1xf32, #tpu.memory_space<vmem>>, vector<32x1xf32>
    %c0_7 = arith.constant 0 : index
    %c0_8 = arith.constant 0 : index
    %c0_9 = arith.constant 0 : index
    %4 = vector.load %arg2[%c0_7, %c0_8, %c0_9] : memref<2x16x128xf32, #tpu.memory_space<vmem>>, vector<1x16x128xf32>
    %5 = vector.shape_cast %4 : vector<1x16x128xf32> to vector<16x128xf32>
    %c0_10 = arith.constant 0 : index
    %c0_11 = arith.constant 0 : index
    %c0_12 = arith.constant 0 : index
    %6 = vector.load %arg3[%c0_10, %c0_11, %c0_12] : memref<2x16x128xf32, #tpu.memory_space<vmem>>, vector<1x16x128xf32>
    %7 = vector.shape_cast %6 : vector<1x16x128xf32> to vector<16x128xf32>
    %8 = arith.addf %5, %7 : vector<16x128xf32>
    %9 = arith.subf %5, %7 : vector<16x128xf32>
    %cst = arith.constant dense<0.000000e+00> : vector<48x128xf32>
    %10 = tpu.matmul %0, %8, %cst {dimension_numbers = #tpu.dot_dimension_numbers<[1], [0], [0], [1], [0, 0, 1, 1], [], []>} : vector<48x16xf32>, vector<16x128xf32>, vector<48x128xf32> -> vector<48x128xf32>
    %11 = vector.broadcast %1 : vector<48x1xf32> to vector<48x128xf32>
    %12 = arith.addf %10, %11 : vector<48x128xf32>
    %cst_13 = arith.constant dense<0.000000e+00> : vector<32x128xf32>
    %13 = tpu.matmul %2, %9, %cst_13 {dimension_numbers = #tpu.dot_dimension_numbers<[1], [0], [0], [1], [0, 0, 1, 1], [], []>} : vector<32x16xf32>, vector<16x128xf32>, vector<32x128xf32> -> vector<32x128xf32>
    %14 = vector.broadcast %3 : vector<32x1xf32> to vector<32x128xf32>
    %15 = arith.addf %13, %14 : vector<32x128xf32>
    %16 = vector.extract_strided_slice %12 {offsets = [0, 0], sizes = [8, 128], strides = [1, 1]} : vector<48x128xf32> to vector<8x128xf32>
    %cst_14 = arith.constant dense<0xFF800000> : vector<128xf32>
    %17 = vector.multi_reduction <maximumf>, %16, %cst_14 [0] : vector<8x128xf32> to vector<128xf32>
    %18 = vector.shape_cast %17 : vector<128xf32> to vector<1x128xf32>
    %19 = vector.broadcast %18 : vector<1x128xf32> to vector<8x128xf32>
    %20 = arith.subf %16, %19 : vector<8x128xf32>
    %21 = math.exp %20 : vector<8x128xf32>
    %cst_15 = arith.constant dense<0.000000e+00> : vector<128xf32>
    %22 = vector.multi_reduction <add>, %21, %cst_15 [0] : vector<8x128xf32> to vector<128xf32>
    %23 = vector.shape_cast %22 : vector<128xf32> to vector<1x128xf32>
    %24 = tpu.reciprocal %23 : vector<1x128xf32> -> vector<1x128xf32>
    %25 = vector.broadcast %24 : vector<1x128xf32> to vector<8x128xf32>
    %26 = arith.mulf %21, %25 : vector<8x128xf32>
    %27 = vector.extract_strided_slice %26 {offsets = [0, 0], sizes = [1, 128], strides = [1, 1]} : vector<8x128xf32> to vector<1x128xf32>
    %28 = vector.extract_strided_slice %12 {offsets = [16, 0], sizes = [8, 128], strides = [1, 1]} : vector<48x128xf32> to vector<8x128xf32>
    %29 = vector.broadcast %27 : vector<1x128xf32> to vector<8x128xf32>
    %30 = arith.mulf %29, %28 : vector<8x128xf32>
    %31 = vector.extract_strided_slice %26 {offsets = [1, 0], sizes = [1, 128], strides = [1, 1]} : vector<8x128xf32> to vector<1x128xf32>
    %32 = vector.extract_strided_slice %12 {offsets = [24, 0], sizes = [8, 128], strides = [1, 1]} : vector<48x128xf32> to vector<8x128xf32>
    %33 = vector.broadcast %31 : vector<1x128xf32> to vector<8x128xf32>
    %34 = arith.mulf %33, %32 : vector<8x128xf32>
    %35 = arith.addf %30, %34 : vector<8x128xf32>
    %36 = vector.extract_strided_slice %26 {offsets = [2, 0], sizes = [1, 128], strides = [1, 1]} : vector<8x128xf32> to vector<1x128xf32>
    %37 = vector.extract_strided_slice %15 {offsets = [0, 0], sizes = [8, 128], strides = [1, 1]} : vector<32x128xf32> to vector<8x128xf32>
    %38 = vector.broadcast %36 : vector<1x128xf32> to vector<8x128xf32>
    %39 = arith.mulf %38, %37 : vector<8x128xf32>
    %40 = arith.addf %35, %39 : vector<8x128xf32>
    %41 = vector.extract_strided_slice %26 {offsets = [3, 0], sizes = [1, 128], strides = [1, 1]} : vector<8x128xf32> to vector<1x128xf32>
    %42 = vector.extract_strided_slice %15 {offsets = [8, 0], sizes = [8, 128], strides = [1, 1]} : vector<32x128xf32> to vector<8x128xf32>
    %43 = vector.broadcast %41 : vector<1x128xf32> to vector<8x128xf32>
    %44 = arith.mulf %43, %42 : vector<8x128xf32>
    %45 = arith.addf %40, %44 : vector<8x128xf32>
    %c0_16 = arith.constant 0 : index
    %c0_17 = arith.constant 0 : index
    %c0_18 = arith.constant 0 : index
    %46 = vector.load %arg8[%c0_16, %c0_17, %c0_18] : memref<2x16x128xf32, #tpu.memory_space<vmem>>, vector<1x8x128xf32>
    %47 = vector.shape_cast %46 : vector<1x8x128xf32> to vector<8x128xf32>
    %48 = vector.shape_cast %45 : vector<8x128xf32> to vector<1x8x128xf32>
    tpu.vector_store %arg8[%c0_16, %c0_17, %c0_18], %48 {strides = array<i32>} : memref<2x16x128xf32, #tpu.memory_space<vmem>>, vector<1x8x128xf32>,
    %49 = vector.extract_strided_slice %12 {offsets = [8, 0], sizes = [8, 128], strides = [1, 1]} : vector<48x128xf32> to vector<8x128xf32>
    %cst_19 = arith.constant dense<0xFF800000> : vector<128xf32>
    %50 = vector.multi_reduction <maximumf>, %49, %cst_19 [0] : vector<8x128xf32> to vector<128xf32>
    %51 = vector.shape_cast %50 : vector<128xf32> to vector<1x128xf32>
    %52 = vector.broadcast %51 : vector<1x128xf32> to vector<8x128xf32>
    %53 = arith.subf %49, %52 : vector<8x128xf32>
    %54 = math.exp %53 : vector<8x128xf32>
    %cst_20 = arith.constant dense<0.000000e+00> : vector<128xf32>
    %55 = vector.multi_reduction <add>, %54, %cst_20 [0] : vector<8x128xf32> to vector<128xf32>
    %56 = vector.shape_cast %55 : vector<128xf32> to vector<1x128xf32>
    %57 = tpu.reciprocal %56 : vector<1x128xf32> -> vector<1x128xf32>
    %58 = vector.broadcast %57 : vector<1x128xf32> to vector<8x128xf32>
    %59 = arith.mulf %54, %58 : vector<8x128xf32>
    %60 = vector.extract_strided_slice %59 {offsets = [0, 0], sizes = [1, 128], strides = [1, 1]} : vector<8x128xf32> to vector<1x128xf32>
    %61 = vector.extract_strided_slice %12 {offsets = [32, 0], sizes = [8, 128], strides = [1, 1]} : vector<48x128xf32> to vector<8x128xf32>
    %62 = vector.broadcast %60 : vector<1x128xf32> to vector<8x128xf32>
    %63 = arith.mulf %62, %61 : vector<8x128xf32>
    %64 = vector.extract_strided_slice %59 {offsets = [1, 0], sizes = [1, 128], strides = [1, 1]} : vector<8x128xf32> to vector<1x128xf32>
    %65 = vector.extract_strided_slice %12 {offsets = [40, 0], sizes = [8, 128], strides = [1, 1]} : vector<48x128xf32> to vector<8x128xf32>
    %66 = vector.broadcast %64 : vector<1x128xf32> to vector<8x128xf32>
    %67 = arith.mulf %66, %65 : vector<8x128xf32>
    %68 = arith.addf %63, %67 : vector<8x128xf32>
    %69 = vector.extract_strided_slice %59 {offsets = [2, 0], sizes = [1, 128], strides = [1, 1]} : vector<8x128xf32> to vector<1x128xf32>
    %70 = vector.extract_strided_slice %15 {offsets = [16, 0], sizes = [8, 128], strides = [1, 1]} : vector<32x128xf32> to vector<8x128xf32>
    %71 = vector.broadcast %69 : vector<1x128xf32> to vector<8x128xf32>
    %72 = arith.mulf %71, %70 : vector<8x128xf32>
    %73 = arith.addf %68, %72 : vector<8x128xf32>
    %74 = vector.extract_strided_slice %59 {offsets = [3, 0], sizes = [1, 128], strides = [1, 1]} : vector<8x128xf32> to vector<1x128xf32>
    %75 = vector.extract_strided_slice %15 {offsets = [24, 0], sizes = [8, 128], strides = [1, 1]} : vector<32x128xf32> to vector<8x128xf32>
    %76 = vector.broadcast %74 : vector<1x128xf32> to vector<8x128xf32>
    %77 = arith.mulf %76, %75 : vector<8x128xf32>
    %78 = arith.addf %73, %77 : vector<8x128xf32>
    %c0_21 = arith.constant 0 : index
    %c8 = arith.constant 8 : index
    %c0_22 = arith.constant 0 : index
    %79 = vector.load %arg8[%c0_21, %c8, %c0_22] : memref<2x16x128xf32, #tpu.memory_space<vmem>>, vector<1x8x128xf32>
    %80 = vector.shape_cast %79 : vector<1x8x128xf32> to vector<8x128xf32>
    %81 = vector.shape_cast %78 : vector<8x128xf32> to vector<1x8x128xf32>
    tpu.vector_store %arg8[%c0_21, %c8, %c0_22], %81 {strides = array<i32>} : memref<2x16x128xf32, #tpu.memory_space<vmem>>, vector<1x8x128xf32>,
    %c1 = arith.constant 1 : index
    %c0_23 = arith.constant 0 : index
    %c0_24 = arith.constant 0 : index
    %82 = vector.load %arg2[%c1, %c0_23, %c0_24] : memref<2x16x128xf32, #tpu.memory_space<vmem>>, vector<1x16x128xf32>
    %83 = vector.shape_cast %82 : vector<1x16x128xf32> to vector<16x128xf32>
    %c1_25 = arith.constant 1 : index
    %c0_26 = arith.constant 0 : index
    %c0_27 = arith.constant 0 : index
    %84 = vector.load %arg3[%c1_25, %c0_26, %c0_27] : memref<2x16x128xf32, #tpu.memory_space<vmem>>, vector<1x16x128xf32>
    %85 = vector.shape_cast %84 : vector<1x16x128xf32> to vector<16x128xf32>
    %86 = arith.addf %83, %85 : vector<16x128xf32>
    %87 = arith.subf %83, %85 : vector<16x128xf32>
    %cst_28 = arith.constant dense<0.000000e+00> : vector<48x128xf32>
    %88 = tpu.matmul %0, %86, %cst_28 {dimension_numbers = #tpu.dot_dimension_numbers<[1], [0], [0], [1], [0, 0, 1, 1], [], []>} : vector<48x16xf32>, vector<16x128xf32>, vector<48x128xf32> -> vector<48x128xf32>
    %89 = vector.broadcast %1 : vector<48x1xf32> to vector<48x128xf32>
    %90 = arith.addf %88, %89 : vector<48x128xf32>
    %cst_29 = arith.constant dense<0.000000e+00> : vector<32x128xf32>
    %91 = tpu.matmul %2, %87, %cst_29 {dimension_numbers = #tpu.dot_dimension_numbers<[1], [0], [0], [1], [0, 0, 1, 1], [], []>} : vector<32x16xf32>, vector<16x128xf32>, vector<32x128xf32> -> vector<32x128xf32>
    %92 = vector.broadcast %3 : vector<32x1xf32> to vector<32x128xf32>
    %93 = arith.addf %91, %92 : vector<32x128xf32>
    %94 = vector.extract_strided_slice %90 {offsets = [0, 0], sizes = [8, 128], strides = [1, 1]} : vector<48x128xf32> to vector<8x128xf32>
    %cst_30 = arith.constant dense<0xFF800000> : vector<128xf32>
    %95 = vector.multi_reduction <maximumf>, %94, %cst_30 [0] : vector<8x128xf32> to vector<128xf32>
    %96 = vector.shape_cast %95 : vector<128xf32> to vector<1x128xf32>
    %97 = vector.broadcast %96 : vector<1x128xf32> to vector<8x128xf32>
    %98 = arith.subf %94, %97 : vector<8x128xf32>
    %99 = math.exp %98 : vector<8x128xf32>
    %cst_31 = arith.constant dense<0.000000e+00> : vector<128xf32>
    %100 = vector.multi_reduction <add>, %99, %cst_31 [0] : vector<8x128xf32> to vector<128xf32>
    %101 = vector.shape_cast %100 : vector<128xf32> to vector<1x128xf32>
    %102 = tpu.reciprocal %101 : vector<1x128xf32> -> vector<1x128xf32>
    %103 = vector.broadcast %102 : vector<1x128xf32> to vector<8x128xf32>
    %104 = arith.mulf %99, %103 : vector<8x128xf32>
    %105 = vector.extract_strided_slice %104 {offsets = [0, 0], sizes = [1, 128], strides = [1, 1]} : vector<8x128xf32> to vector<1x128xf32>
    %106 = vector.extract_strided_slice %90 {offsets = [16, 0], sizes = [8, 128], strides = [1, 1]} : vector<48x128xf32> to vector<8x128xf32>
    %107 = vector.broadcast %105 : vector<1x128xf32> to vector<8x128xf32>
    %108 = arith.mulf %107, %106 : vector<8x128xf32>
    %109 = vector.extract_strided_slice %104 {offsets = [1, 0], sizes = [1, 128], strides = [1, 1]} : vector<8x128xf32> to vector<1x128xf32>
    %110 = vector.extract_strided_slice %90 {offsets = [24, 0], sizes = [8, 128], strides = [1, 1]} : vector<48x128xf32> to vector<8x128xf32>
    %111 = vector.broadcast %109 : vector<1x128xf32> to vector<8x128xf32>
    %112 = arith.mulf %111, %110 : vector<8x128xf32>
    %113 = arith.addf %108, %112 : vector<8x128xf32>
    %114 = vector.extract_strided_slice %104 {offsets = [2, 0], sizes = [1, 128], strides = [1, 1]} : vector<8x128xf32> to vector<1x128xf32>
    %115 = vector.extract_strided_slice %93 {offsets = [0, 0], sizes = [8, 128], strides = [1, 1]} : vector<32x128xf32> to vector<8x128xf32>
    %116 = vector.broadcast %114 : vector<1x128xf32> to vector<8x128xf32>
    %117 = arith.mulf %116, %115 : vector<8x128xf32>
    %118 = arith.addf %113, %117 : vector<8x128xf32>
    %119 = vector.extract_strided_slice %104 {offsets = [3, 0], sizes = [1, 128], strides = [1, 1]} : vector<8x128xf32> to vector<1x128xf32>
    %120 = vector.extract_strided_slice %93 {offsets = [8, 0], sizes = [8, 128], strides = [1, 1]} : vector<32x128xf32> to vector<8x128xf32>
    %121 = vector.broadcast %119 : vector<1x128xf32> to vector<8x128xf32>
    %122 = arith.mulf %121, %120 : vector<8x128xf32>
    %123 = arith.addf %118, %122 : vector<8x128xf32>
    %c1_32 = arith.constant 1 : index
    %c0_33 = arith.constant 0 : index
    %c0_34 = arith.constant 0 : index
    %124 = vector.load %arg8[%c1_32, %c0_33, %c0_34] : memref<2x16x128xf32, #tpu.memory_space<vmem>>, vector<1x8x128xf32>
    %125 = vector.shape_cast %124 : vector<1x8x128xf32> to vector<8x128xf32>
    %126 = vector.shape_cast %123 : vector<8x128xf32> to vector<1x8x128xf32>
    tpu.vector_store %arg8[%c1_32, %c0_33, %c0_34], %126 {strides = array<i32>} : memref<2x16x128xf32, #tpu.memory_space<vmem>>, vector<1x8x128xf32>,
    %127 = vector.extract_strided_slice %90 {offsets = [8, 0], sizes = [8, 128], strides = [1, 1]} : vector<48x128xf32> to vector<8x128xf32>
    %cst_35 = arith.constant dense<0xFF800000> : vector<128xf32>
    %128 = vector.multi_reduction <maximumf>, %127, %cst_35 [0] : vector<8x128xf32> to vector<128xf32>
    %129 = vector.shape_cast %128 : vector<128xf32> to vector<1x128xf32>
    %130 = vector.broadcast %129 : vector<1x128xf32> to vector<8x128xf32>
    %131 = arith.subf %127, %130 : vector<8x128xf32>
    %132 = math.exp %131 : vector<8x128xf32>
    %cst_36 = arith.constant dense<0.000000e+00> : vector<128xf32>
    %133 = vector.multi_reduction <add>, %132, %cst_36 [0] : vector<8x128xf32> to vector<128xf32>
    %134 = vector.shape_cast %133 : vector<128xf32> to vector<1x128xf32>
    %135 = tpu.reciprocal %134 : vector<1x128xf32> -> vector<1x128xf32>
    %136 = vector.broadcast %135 : vector<1x128xf32> to vector<8x128xf32>
    %137 = arith.mulf %132, %136 : vector<8x128xf32>
    %138 = vector.extract_strided_slice %137 {offsets = [0, 0], sizes = [1, 128], strides = [1, 1]} : vector<8x128xf32> to vector<1x128xf32>
    %139 = vector.extract_strided_slice %90 {offsets = [32, 0], sizes = [8, 128], strides = [1, 1]} : vector<48x128xf32> to vector<8x128xf32>
    %140 = vector.broadcast %138 : vector<1x128xf32> to vector<8x128xf32>
    %141 = arith.mulf %140, %139 : vector<8x128xf32>
    %142 = vector.extract_strided_slice %137 {offsets = [1, 0], sizes = [1, 128], strides = [1, 1]} : vector<8x128xf32> to vector<1x128xf32>
    %143 = vector.extract_strided_slice %90 {offsets = [40, 0], sizes = [8, 128], strides = [1, 1]} : vector<48x128xf32> to vector<8x128xf32>
    %144 = vector.broadcast %142 : vector<1x128xf32> to vector<8x128xf32>
    %145 = arith.mulf %144, %143 : vector<8x128xf32>
    %146 = arith.addf %141, %145 : vector<8x128xf32>
    %147 = vector.extract_strided_slice %137 {offsets = [2, 0], sizes = [1, 128], strides = [1, 1]} : vector<8x128xf32> to vector<1x128xf32>
    %148 = vector.extract_strided_slice %93 {offsets = [16, 0], sizes = [8, 128], strides = [1, 1]} : vector<32x128xf32> to vector<8x128xf32>
    %149 = vector.broadcast %147 : vector<1x128xf32> to vector<8x128xf32>
    %150 = arith.mulf %149, %148 : vector<8x128xf32>
    %151 = arith.addf %146, %150 : vector<8x128xf32>
    %152 = vector.extract_strided_slice %137 {offsets = [3, 0], sizes = [1, 128], strides = [1, 1]} : vector<8x128xf32> to vector<1x128xf32>
    %153 = vector.extract_strided_slice %93 {offsets = [24, 0], sizes = [8, 128], strides = [1, 1]} : vector<32x128xf32> to vector<8x128xf32>
    %154 = vector.broadcast %152 : vector<1x128xf32> to vector<8x128xf32>
    %155 = arith.mulf %154, %153 : vector<8x128xf32>
    %156 = arith.addf %151, %155 : vector<8x128xf32>
    %c1_37 = arith.constant 1 : index
    %c8_38 = arith.constant 8 : index
    %c0_39 = arith.constant 0 : index
    %157 = vector.load %arg8[%c1_37, %c8_38, %c0_39] : memref<2x16x128xf32, #tpu.memory_space<vmem>>, vector<1x8x128xf32>
    %158 = vector.shape_cast %157 : vector<1x8x128xf32> to vector<8x128xf32>
    %159 = vector.shape_cast %156 : vector<8x128xf32> to vector<1x8x128xf32>
    tpu.vector_store %arg8[%c1_37, %c8_38, %c0_39], %159 {strides = array<i32>} : memref<2x16x128xf32, #tpu.memory_space<vmem>>, vector<1x8x128xf32>,
    return
  }
  func.func @transform_0(%arg0: i32, %arg1: i32) -> (i32, i32, i32) {
    %c0_i32 = arith.constant 0 : i32
    %c0_i32_0 = arith.constant 0 : i32
    return %arg0, %c0_i32, %arg1 : i32, i32, i32
  }
  func.func @transform_1(%arg0: i32, %arg1: i32) -> (i32, i32, i32) {
    %c0_i32 = arith.constant 0 : i32
    %c0_i32_0 = arith.constant 0 : i32
    return %arg0, %c0_i32, %arg1 : i32, i32, i32
  }
  func.func @transform_2(%arg0: i32, %arg1: i32) -> (i32, i32) {
    %c0_i32 = arith.constant 0 : i32
    %c0_i32_0 = arith.constant 0 : i32
    %c0_i32_1 = arith.constant 0 : i32
    return %c0_i32, %c0_i32_0 : i32, i32
  }
  func.func @transform_3(%arg0: i32, %arg1: i32) -> (i32, i32) {
    %c0_i32 = arith.constant 0 : i32
    %c0_i32_0 = arith.constant 0 : i32
    %c0_i32_1 = arith.constant 0 : i32
    return %c0_i32, %c0_i32_0 : i32, i32
  }
  func.func @transform_4(%arg0: i32, %arg1: i32) -> (i32, i32) {
    %c0_i32 = arith.constant 0 : i32
    %c0_i32_0 = arith.constant 0 : i32
    %c0_i32_1 = arith.constant 0 : i32
    return %c0_i32, %c0_i32_0 : i32, i32
  }
  func.func @transform_5(%arg0: i32, %arg1: i32) -> (i32, i32) {
    %c0_i32 = arith.constant 0 : i32
    %c0_i32_0 = arith.constant 0 : i32
    %c0_i32_1 = arith.constant 0 : i32
    return %c0_i32, %c0_i32_0 : i32, i32
  }
  func.func @transform_6(%arg0: i32, %arg1: i32) -> (i32, i32, i32) {
    %c0_i32 = arith.constant 0 : i32
    %c0_i32_0 = arith.constant 0 : i32
    return %arg0, %c0_i32, %arg1 : i32, i32, i32
  }
}

</mosaic_0001>

<bundles_post_ra>
// kernel: tile.13
= control target key start
LH: loop header
LB: loop body
LE: loop exit
PB: predicated region body
PF: predicated region fallthrough
CT: control target
= control target key end

     0   :  { %vm7_vm0 = vcmask 64512   ;;  %vm13_vm1 = vcmask 130112   ;;  %s39_s0 = inlined_call_operand.vmem [shape: f32[2,8], index: 0, kind: input, shape index: {}]   ;;  %s40_s1 = inlined_call_operand.vmem [shape: f32[16], index: 1, kind: output, shape index: {}]  }
   0x1   :  { %v4_v0 = vld [vmem:[%s39_s0] sm:$0x3]  ;;  %s22_s0 = smov 8  }
   0x2   :  { %5 = vst [vmem:[#allocation1] sm:$0x3] %v4_v0 }
   0x9   :  { %v10_v1 = vld [vmem:[#allocation1 + $0x1] sm:$0x1]   ;;  %v6_v2 = vld [vmem:[#allocation1] sm:$0x1]  }
   0xa   :  { %11 = vrot.lane.b32.xlu0 %v10_v1, %s22_s0  ;;  %8 = vst.msk [vmem:[#allocation0] sm:$0x1] %vm7_vm0, %v6_v2  }
  0x7c   :  { %v12_v3 = vpop.permute.xlu0 %11  }
  0x7d   :  { %14 = vst.msk [vmem:[#allocation0] sm:$0x1] %vm13_vm1, %v12_v3  }
  0x84   :  { %v17_v4 = vld [vmem:[#allocation0] sm:$0x1] }
  0x85   :  { %20 = vst [vmem:[%s40_s1] sm:$0x1] %v17_v4 }

// kernel: tile.11
= control target key start
LH: loop header
LB: loop body
LE: loop exit
PB: predicated region body
PF: predicated region fallthrough
CT: control target
= control target key end

     0   :  { %vm7_vm0 = vcmask 130048   ;;  %vm13_vm1 = vcmask 261248   ;;  %s39_s0 = inlined_call_operand.vmem [shape: f32[2,16], index: 0, kind: input, shape index: {}]   ;;  %s40_s1 = inlined_call_operand.vmem [shape: f32[32,1], index: 1, kind: output, shape index: {}]  }
   0x1   :  { %v4_v0 = vld [vmem:[%s39_s0] sm:$0x3]  ;;  %s22_s0 = smov 16  }
   0x2   :  { %5 = vst [vmem:[#allocation1] sm:$0x3] %v4_v0 }
   0x9   :  { %v10_v1 = vld [vmem:[#allocation1 + $0x1] sm:$0x1]   ;;  %v6_v2 = vld [vmem:[#allocation1] sm:$0x1]  }
   0xa   :  { %11 = vrot.lane.b32.xlu0 %v10_v1, %s22_s0  ;;  %8 = vst.msk [vmem:[#allocation0] sm:$0x1] %vm7_vm0, %v6_v2  }
  0x7c   :  { %v12_v3 = vpop.permute.xlu0 %11  }
  0x7d   :  { %14 = vst.msk [vmem:[#allocation0] sm:$0x1] %vm13_vm1, %v12_v3  }
  0x84   :  { %v17_v4 = vld [vmem:[#allocation0] sm:$0x1] }
  0x85   :  { %20 = vst [vmem:[%s40_s1] sm:$0x1] %v17_v4 }

// kernel: tile.14
= control target key start
LH: loop header
LB: loop body
LE: loop exit
PB: predicated region body
PF: predicated region fallthrough
CT: control target
= control target key end

     0   :  { %s22_s0 = inlined_call_operand.vmem [shape: f32[16], index: 0, kind: input, shape index: {}]   ;;  %s23_s1 = inlined_call_operand.vmem [shape: f32[2,16], index: 1, kind: output, shape index: {}]  }
   0x1   :  { %v4_v0 = vld [vmem:[%s22_s0] ss:$0 sm:$0xff] }
   0x2   :  { %5 = vst [vmem:[%s23_s1] sm:$0x3] %v4_v0 }

// kernel: tile.0
= control target key start
LH: loop header
LB: loop body
LE: loop exit
PB: predicated region body
PF: predicated region fallthrough
CT: control target
= control target key end

     0   :  { %s130_s8 = smov 127   ;;  %s131_s9 = smov 123   ;;  %vm7_vm0 = vcmask 7168   ;;  %s221_s0 = inlined_call_operand.vmem [shape: f32[2,16], index: 0, kind: input, shape index: {}]   ;;  %s222_s1 = inlined_call_operand.vmem [shape: f32[32,1], index: 1, kind: output, shape index: {}]  }
   0x1   :  { %v4_v0 = vld [vmem:[%s221_s0] sm:$0x3]  ;;  %s129_s0 = smov 125   ;;  %s132_s10 = smov 124  }
   0x2   :  { %5 = vst [vmem:[#allocation0] sm:$0x3] %v4_v0  ;;  %s133_s11 = smov 126   ;;  %s134_s12 = smov 122  }
   0x3   :  { %s135_s13 = smov 120   ;;  %s136_s14 = smov 121  }
   0x4   :  { %s137_s15 = smov 119   ;;  %s138_s16 = smov 117  }
   0x5   :  { %s139_s17 = smov 118   ;;  %s140_s18 = smov 116  }
   0x6   :  { %s141_s19 = smov 114   ;;  %s142_s20 = smov 115  }
   0x7   :  { %s143_s21 = smov 113  }
   0x9   :  { %v21_v1 = vld [vmem:[#allocation0] sm:$0x3]  }
   0xa   :  { %v9_v2 = vld [vmem:[#allocation0] sm:$0x3]   ;;  %22 = vrot.lane.b32.xlu1 %v21_v1, %s129_s0 }
   0xb   :  { %10 = vrot.lane.b32.xlu0 %v9_v2, %s130_s8  ;;  %v33_v3 = vld [vmem:[#allocation0] sm:$0x3]  }
   0xc   :  { %34 = vrot.lane.b32.xlu2 %v33_v3, %s131_s9  ;;  %v27_v4 = vld [vmem:[#allocation0] sm:$0x3]  }
   0xd   :  { %v15_v5 = vld [vmem:[#allocation0] sm:$0x3]  }
   0xe   :  { %v39_v6 = vld [vmem:[#allocation0] sm:$0x3]  }
   0xf   :  { %v51_v7 = vld [vmem:[#allocation0] sm:$0x3]  }
  0x10   :  { %v45_v8 = vld [vmem:[#allocation0] sm:$0x3]  }
  0x11   :  { %v57_v9 = vld [vmem:[#allocation0] sm:$0x3]  }
  0x12   :  { %28 = vrot.lane.b32.xlu1 %v27_v4, %s132_s10  ;;  %v69_v10 = vld [vmem:[#allocation0] sm:$0x3]  }
  0x13   :  { %16 = vrot.lane.b32.xlu0 %v15_v5, %s133_s11  ;;  %v63_v11 = vld [vmem:[#allocation0] sm:$0x3]  }
  0x14   :  { %40 = vrot.lane.b32.xlu2 %v39_v6, %s134_s12  ;;  %v75_v12 = vld [vmem:[#allocation0] sm:$0x3]  }
  0x15   :  { %v87_v13 = vld [vmem:[#allocation0] sm:$0x3]  }
  0x16   :  { %v81_v14 = vld [vmem:[#allocation0] sm:$0x3]  }
  0x17   :  { %v93_v15 = vld [vmem:[#allocation0] sm:$0x3]  }
  0x18   :  { %v6_v21 = vld [vmem:[#allocation0] sm:$0x3]  }
  0x19   :  { %8 = vst.msk [vmem:[%s222_s1] ss:$16 sm:$0x3] %vm7_vm0, %v6_v21  }
  0x1a   :  { %52 = vrot.lane.b32.xlu1 %v51_v7, %s135_s13 }
  0x1b   :  { %46 = vrot.lane.b32.xlu0 %v45_v8, %s136_s14 }
  0x1c   :  { %58 = vrot.lane.b32.xlu2 %v57_v9, %s137_s15 }
  0x22   :  { %70 = vrot.lane.b32.xlu1 %v69_v10, %s138_s16 }
  0x23   :  { %64 = vrot.lane.b32.xlu0 %v63_v11, %s139_s17 }
  0x24   :  { %76 = vrot.lane.b32.xlu2 %v75_v12, %s140_s18 }
  0x2a   :  { %88 = vrot.lane.b32.xlu1 %v87_v13, %s141_s19 }
  0x2b   :  { %82 = vrot.lane.b32.xlu0 %v81_v14, %s142_s20 }
  0x2c   :  { %94 = vrot.lane.b32.xlu2 %v93_v15, %s143_s21 }
  0x66   :  { %v35_v16 = vpop.permute.xlu2 %34  }
  0x67   :  { %103 = vst.msk [vmem:[%s222_s1 + $0x5] ss:$16 sm:$0x3] %vm7_vm0, %v35_v16  }
  0x6e   :  { %v41_v17 = vpop.permute.xlu2 %40  }
  0x6f   :  { %104 = vst.msk [vmem:[%s222_s1 + $0x6] ss:$16 sm:$0x3] %vm7_vm0, %v41_v17  }
  0x76   :  { %v59_v18 = vpop.permute.xlu2 %58  }
  0x77   :  { %107 = vst.msk [vmem:[%s222_s1 + $0x9] ss:$16 sm:$0x3] %vm7_vm0, %v59_v18  }
  0x7c   :  { %v23_v19 = vpop.permute.xlu1 %22  }
  0x7d   :  { %v11_v20 = vpop.permute.xlu0 %10   ;;  %101 = vst.msk [vmem:[%s222_s1 + $0x3] ss:$16 sm:$0x3] %vm7_vm0, %v23_v19  }
  0x7e   :  { %99 = vst.msk [vmem:[%s222_s1 + $0x1] ss:$16 sm:$0x3] %vm7_vm0, %v11_v20   ;;  %v77_v22 = vpop.permute.xlu2 %76  }
  0x7f   :  { %110 = vst.msk [vmem:[%s222_s1 + $0xc] ss:$16 sm:$0x3] %vm7_vm0, %v77_v22  }
  0x84   :  { %v29_v23 = vpop.permute.xlu1 %28  }
  0x85   :  { %v17_v24 = vpop.permute.xlu0 %16   ;;  %102 = vst.msk [vmem:[%s222_s1 + $0x4] ss:$16 sm:$0x3] %vm7_vm0, %v29_v23  }
  0x86   :  { %100 = vst.msk [vmem:[%s222_s1 + $0x2] ss:$16 sm:$0x3] %vm7_vm0, %v17_v24   ;;  %v95_v25 = vpop.permute.xlu2 %94  }
  0x87   :  { %113 = vst.msk [vmem:[%s222_s1 + $0xf] ss:$16 sm:$0x3] %vm7_vm0, %v95_v25  }
  0x8c   :  { %v53_v26 = vpop.permute.xlu1 %52  }
  0x8d   :  { %v47_v27 = vpop.permute.xlu0 %46   ;;  %106 = vst.msk [vmem:[%s222_s1 + $0x8] ss:$16 sm:$0x3] %vm7_vm0, %v53_v26  }
  0x8e   :  { %105 = vst.msk [vmem:[%s222_s1 + $0x7] ss:$16 sm:$0x3] %vm7_vm0, %v47_v27  }
  0x94   :  { %v71_v28 = vpop.permute.xlu1 %70  }
  0x95   :  { %v65_v29 = vpop.permute.xlu0 %64   ;;  %109 = vst.msk [vmem:[%s222_s1 + $0xb] ss:$16 sm:$0x3] %vm7_vm0, %v71_v28  }
  0x96   :  { %108 = vst.msk [vmem:[%s222_s1 + $0xa] ss:$16 sm:$0x3] %vm7_vm0, %v65_v29  }
  0x9c   :  { %v89_v30 = vpop.permute.xlu1 %88  }
  0x9d   :  { %v83_v31 = vpop.permute.xlu0 %82   ;;  %112 = vst.msk [vmem:[%s222_s1 + $0xe] ss:$16 sm:$0x3] %vm7_vm0, %v89_v30  }
  0x9e   :  { %111 = vst.msk [vmem:[%s222_s1 + $0xd] ss:$16 sm:$0x3] %vm7_vm0, %v83_v31  }

// kernel: pmffm_pallas.1
= control target key start
LH: loop header
LB: loop body
LE: loop exit
PB: predicated region body
PF: predicated region fallthrough
CT: control target
= control target key end

     0   :  { %s1131_s21 = smov 0   ;;  %s1133_s22 = smov 0   ;;  %s1382_s0 = inlined_call_operand.vmem [shape: f32[2,16,256], index: 0, kind: input, shape index: {}]   ;;  %s1383_s1 = inlined_call_operand.vmem [shape: f32[2,16,256], index: 1, kind: input, shape index: {}]   ;;  %s1384_s2 = inlined_call_operand.vmem [shape: f32[48,16], index: 2, kind: input, shape index: {}]   ;;  %s1385_s3 = inlined_call_operand.vmem [shape: f32[48,1], index: 3, kind: input, shape index: {}]   ;;  %s1386_s4 = inlined_call_operand.vmem [shape: f32[32,16], index: 4, kind: input, shape index: {}]   ;;  %s1387_s5 = inlined_call_operand.vmem [shape: f32[32,1], index: 5, kind: input, shape index: {}]   ;;  %s1388_s6 = inlined_call_operand.vmem [shape: f32[2,16,256], index: 6, kind: output, shape index: {}]  }
   0x1   :  { %s1135_s23 = smov 0   ;;  %s1137_s24 = smov 0  }
   0x2   :  { %s1139_s25 = smov 0  }
   0x3 LB: > { %s25_s26 = sadd.s32 1, %s1089_s24  ;;  %s949_s27 = sadd.s32 4294967295, %s1093_s25   ;;  %s1093_s25 = sphi %s1139_s25, %s16_s25   ;;  %s1089_s24 = sphi %s1137_s24, %s1394_s24   ;;  %s1085_s23 = sphi %s1135_s23, %s1393_s23   ;;  %s1081_s22 = sphi %s1133_s22, %s1392_s22   ;;  %s1077_s21 = sphi %s1131_s21, %s1391_s21  }
   0x4   : > { %p26_p0 = scmp.ge.s32.totalorder %s25_s26, 2  ;;  %p44_p1 = scmp.ne.s32.totalorder %s1081_s22, %s1077_s21 }
   0x5   : > { %p45_p2 = scmp.eq.s32.totalorder %s1093_s25, 0  ;;  %p188_p4 = scmp.eq.s32.totalorder %s949_s27, 1 }
   0x6   : > { %s1396_s26 = smov (%p26_p0, %s25_s26), 0  ;;  %s37_s30 = sadd.s32 1, %s1081_s22 }
   0x7   : > { %p1163_p3 = por %p45_p2, %p44_p1  ;;  %s33_s29 = ssub.s32 %s1089_s24, %s1396_s26 }
   0x8   : > { %p35_p5 = scmp.eq.s32.totalorder %s33_s29, 0  ;;  %p1170_p6 = por %p188_p4, %p44_p1 }
   0x9   : > { %p952_p7 = scmp.ge.s32.totalorder %s1093_s25, 2 }
   0xa   : > { %s1175_s8 = scalar_select %p35_p5, %s1081_s22, %s37_s30  }
   0xb   : > { %222 = sbr.rel (%p952_p7) target bundleno = 32 (0x20), region = 32 }
  0x10   : > { %225 = sbr.rel (!%p1163_p3) target bundleno = 24 (0x18), region = 36  ;;  %s227_s9 = sand.u32 (%p1163_p3), 1, %s1081_s22  }
  0x11   : > { %s954_s10 = sshll.u32 (%p1163_p3), %s1089_s24, 3  ;;  %s953_s11 = sshll.u32 (%p1163_p3), %s227_s9, 5 }
  0x12   : > { %s234_s14 = scalar_lea.vmem (%p1163_p3), %s1382_s0, %s954_s10  ;;  %s229_s15 = scalar_lea.vmem (%p1163_p3), [#allocation2], %s953_s11 }
  0x13   : > { %v269_v0 = vld [vmem:[%s234_s14] sm:$0xff] (%p1163_p3)  ;;  %v271_v1 = vld [vmem:[%s234_s14 + $0x10] sm:$0xff] (%p1163_p3) }
  0x14   : > { %v273_v2 = vld [vmem:[%s234_s14 + $0x20] sm:$0xff] (%p1163_p3)  ;;  %270 = vst [vmem:[%s229_s15] sm:$0xff] (%p1163_p3), %v269_v0  ;;  %v275_v3 = vld [vmem:[%s234_s14 + $0x30] sm:$0xff] (%p1163_p3) }
  0x15   : > { %272 = vst [vmem:[%s229_s15 + $0x8] sm:$0xff] %v271_v1 }
  0x16   : > { %274 = vst [vmem:[%s229_s15 + $0x10] sm:$0xff] %v273_v2 }
  0x17   : > { %276 = vst [vmem:[%s229_s15 + $0x18] sm:$0xff] %v275_v3 }
  0x18 PF: > { %282 = sbr.rel (!%p1163_p3) target bundleno = 32 (0x20), region = 74  ;;  %s284_s16 = sand.u32 (%p1163_p3), 1, %s1081_s22  }
  0x19   : > { %s956_s17 = sshll.u32 (%p1163_p3), %s1089_s24, 3  ;;  %s955_s18 = sshll.u32 (%p1163_p3), %s284_s16, 5 }
  0x1a   : > { %s291_s27 = scalar_lea.vmem (%p1163_p3), %s1383_s1, %s956_s17  ;;  %s286_s29 = scalar_lea.vmem (%p1163_p3), [#allocation3], %s955_s18 }
  0x1b   : > { %v326_v4 = vld [vmem:[%s291_s27] sm:$0xff] (%p1163_p3)  ;;  %v328_v5 = vld [vmem:[%s291_s27 + $0x10] sm:$0xff] (%p1163_p3) }
  0x1c   : > { %v330_v6 = vld [vmem:[%s291_s27 + $0x20] sm:$0xff] (%p1163_p3)  ;;  %327 = vst [vmem:[%s286_s29] sm:$0xff] (%p1163_p3), %v326_v4  ;;  %v332_v7 = vld [vmem:[%s291_s27 + $0x30] sm:$0xff] (%p1163_p3) }
  0x1d   : > { %329 = vst [vmem:[%s286_s29 + $0x8] sm:$0xff] %v328_v5 }
  0x1e   : > { %331 = vst [vmem:[%s286_s29 + $0x10] sm:$0xff] %v330_v6 }
  0x1f   : > { %333 = vst [vmem:[%s286_s29 + $0x18] sm:$0xff] %v332_v7 }
  0x20 PF: > { %p957_p8 = scmp.ge.s32.totalorder %s1093_s25, 1  ;;  %p338_p9 = scmp.lt.s32.totalorder %s1093_s25, 3 }
  0x22   : > { %p339_p10 = pnand %p957_p8, %p338_p9 }
  0x23   : > { %s345_s9 = sand.u32 (!%p339_p10), 1, %s1077_s21  }
  0x24   : > { %342 = sbr.rel (%p339_p10) target bundleno = 265 (0x109), region = 112  ;;  %s1198_s10 = sshll.u32 (!%p339_p10), %s345_s9, 5 }
  0x25   : > { %s347_s11 = scalar_lea.vmem (!%p339_p10), [#allocation2], %s1198_s10  ;;  %s354_s12 = scalar_lea.vmem (!%p339_p10), [#allocation3], %s1198_s10 }
  0x26   : > { %s1346_s18 = scalar_lea.vmem (!%p339_p10), [#allocation4], %s1198_s10 }
  0x29   : > { %v393_v8 = vld [vmem:[%s1385_s3] sm:$0xff]  ;;  %v1095_v9 = vmov 0   ;;  %v408_v10 = vld [vmem:[%s347_s11 + $0x8] sm:$0xff]  ;;  %v972_v12 = vld [vmem:[%s347_s11 + $0x18] sm:$0xff]  ;;  %vm445_vm0 = vcmask 130048   ;;  %s988_s10 = sshll.u32 (%p1170_p6), %s1085_s23, 3 }
  0x2a   : > { %1036 = vset.pattern.permute.xlu0 %v1095_v9  ;;  %1037 = vset.pattern.permute.xlu1 %v1095_v9  ;;  %v410_v11 = vld [vmem:[%s354_s12 + $0x8] sm:$0xff]  ;;  %v974_v14 = vld [vmem:[%s354_s12 + $0x18] sm:$0xff]  ;;  %v407_v15 = vld [vmem:[%s347_s11] sm:$0xff]  ;;  %s814_s27 = scalar_lea.vmem (%p1170_p6), %s1388_s6, %s988_s10 }
  0x2b   : > { %417 = vperm.xlu0 %1036, %v393_v8   ;;  %1038 = vset.pattern.permute.xlu2 %v1095_v9  ;;  %v412_v13 = vadd.f32 %v410_v11, %v408_v10  ;;  %v409_v16 = vld [vmem:[%s354_s12] sm:$0xff]  ;;  %v651_v17 = vadd.f32 %v974_v14, %v972_v12  ;;  %v971_v19 = vld [vmem:[%s347_s11 + $0x10] sm:$0xff]  ;;  %v392_v23 = vld [vmem:[%s1384_s2 + $0x28] sm:$0xff]  ;;  %v414_v24 = vsub.f32 %v408_v10, %v410_v11 }
  0x2c   : > { %v411_v18 = vadd.f32 %v409_v16, %v407_v15  ;;  %v973_v20 = vld [vmem:[%s354_s12 + $0x10] sm:$0xff]  ;;  %v387_v22 = vld [vmem:[%s1384_s2] sm:$0xff]  ;;  %v394_v25 = vld [vmem:[%s1385_s3 + $0x8] sm:$0xff]  ;;  %v653_v26 = vsub.f32 %v972_v12, %v974_v14  ;;  %v413_v27 = vsub.f32 %v407_v15, %v409_v16 }
  0x2d   : > { %478 = vmatpush.msra.mxu0 %v412_v13  ;;  %991 = vmatpush.msra.mxu1 %v412_v13  ;;  %v650_v21 = vadd.f32 %v973_v20, %v971_v19  ;;  %v652_v28 = vsub.f32 %v971_v19, %v973_v20  ;;  %v395_v29 = vld [vmem:[%s1385_s3 + $0x10] sm:$0xff]  ;;  %v397_v30 = vld [vmem:[%s1385_s3 + $0x20] sm:$0xff]  ;;  %v388_v31 = vld [vmem:[%s1384_s2 + $0x8] sm:$0xff] }
  0x2e   : > { %668 = vmatpush.msra.mxu2 %v651_v17  ;;  %993 = vmatpush.msra.mxu3 %v651_v17  ;;  %v399_v32 = vld [vmem:[%s1386_s4] sm:$0xff]  ;;  %v396_v34 = vld [vmem:[%s1385_s3 + $0x18] sm:$0xff]  ;;  %v398_v35 = vld [vmem:[%s1385_s3 + $0x28] sm:$0xff] }
  0x2f   : > { %479 = vmatpush.msra.mxu0 %v411_v18  ;;  %992 = vmatpush.msra.mxu1 %v411_v18  ;;  %v403_v33 = vld [vmem:[%s1387_s5] sm:$0xff]  ;;  %v400_v36 = vld [vmem:[%s1386_s4 + $0x8] sm:$0xff]  ;;  %v389_v37 = vld [vmem:[%s1384_s2 + $0x10] sm:$0xff] }
  0x30   : > { %669 = vmatpush.msra.mxu2 %v650_v21  ;;  %994 = vmatpush.msra.mxu3 %v650_v21  ;;  %v406_v38 = vld [vmem:[%s1387_s5 + $0x18] sm:$0xff]  ;;  %v405_v39 = vld [vmem:[%s1387_s5 + $0x10] sm:$0xff]  ;;  %v404_v40 = vld [vmem:[%s1387_s5 + $0x8] sm:$0xff] }
  0x31   : > { %961 = vmatmul.msk.f32.vlgmr.msra.gmra.mxu0 %vm445_vm0, %v387_v22  ;;  %966 = vmatmul.msk.f32.vlgmr.msra.gmra.mxu1 %vm445_vm0, %v392_v23  ;;  %v401_v41 = vld [vmem:[%s1386_s4 + $0x10] sm:$0xff]  ;;  %v390_v42 = vld [vmem:[%s1384_s2 + $0x18] sm:$0xff]  ;;  %v391_v44 = vld [vmem:[%s1384_s2 + $0x20] sm:$0xff] }
  0x32   : > { %975 = vmatmul.msk.f32.vlgmr.msra.gmra.mxu2 %vm445_vm0, %v387_v22  ;;  %980 = vmatmul.msk.f32.vlgmr.msra.gmra.mxu3 %vm445_vm0, %v392_v23  ;;  %v402_v43 = vld [vmem:[%s1386_s4 + $0x18] sm:$0xff] }
  0x33   : > { %422 = vperm.xlu0 %1036, %v394_v25   ;;  %545 = vmatpush.msrb.mxu1 %v414_v24 }
  0x34   : > { %703 = vmatpush.msrb.mxu3 %v653_v26  ;;  %427 = vperm.xlu1 %1037, %v395_v29  }
  0x35   : > { %546 = vmatpush.msrb.mxu1 %v413_v27  ;;  %437 = vperm.xlu2 %1038, %v397_v30  }
  0x36   : > { %704 = vmatpush.msrb.mxu3 %v652_v28 }
  0x39   : > { %962 = vmatmul.msk.f32.gmra.mxu0 %vm445_vm0, %v388_v31  ;;  %967 = vmatmul.msk.f32.vlgmr.msrb.gmra.mxu1 %vm445_vm0, %v399_v32 }
  0x3a   : > { %976 = vmatmul.msk.f32.gmra.mxu2 %vm445_vm0, %v388_v31  ;;  %981 = vmatmul.msk.f32.vlgmr.msrb.gmra.mxu3 %vm445_vm0, %v399_v32 }
  0x3b   : > { %501 = vperm.xlu0 %1036, %v403_v33  }
  0x3c   : > { %432 = vperm.xlu1 %1037, %v396_v34  }
  0x3d   : > { %442 = vperm.xlu2 %1038, %v398_v35  }
  0x41   : > { %968 = vmatmul.msk.f32.gmra.mxu1 %vm445_vm0, %v400_v36  ;;  %963 = vmatmul.msk.f32.gmra.mxu0 %vm445_vm0, %v389_v37 }
  0x42   : > { %982 = vmatmul.msk.f32.gmra.mxu3 %vm445_vm0, %v400_v36  ;;  %977 = vmatmul.msk.f32.gmra.mxu2 %vm445_vm0, %v389_v37 }
  0x43   : > { %516 = vperm.xlu0 %1036, %v406_v38  }
  0x44   : > { %511 = vperm.xlu1 %1037, %v405_v39  }
  0x45   : > { %506 = vperm.xlu2 %1038, %v404_v40  }
  0x49   : > { %969 = vmatmul.msk.f32.gmra.mxu1 %vm445_vm0, %v401_v41  ;;  %964 = vmatmul.msk.f32.gmra.mxu0 %vm445_vm0, %v390_v42 }
  0x4a   : > { %983 = vmatmul.msk.f32.gmra.mxu3 %vm445_vm0, %v401_v41  ;;  %978 = vmatmul.msk.f32.gmra.mxu2 %vm445_vm0, %v390_v42 }
  0x51   : > { %970 = vmatmul.msk.f32.gmra.mxu1 %vm445_vm0, %v402_v43  ;;  %965 = vmatmul.msk.f32.gmra.mxu0 %vm445_vm0, %v391_v44 }
  0x52   : > { %984 = vmatmul.msk.f32.gmra.mxu3 %vm445_vm0, %v402_v43  ;;  %979 = vmatmul.msk.f32.gmra.mxu2 %vm445_vm0, %v391_v44 }
  0x8f   : > { %v1285_v28 = vpop.permute.xlu2 %437 }
  0x9d   : > { %v418_v45 = vpop.permute.xlu0 %417 }
  0xa5   : > { %v423_v52 = vpop.permute.xlu0 %422 }
  0xae   : > { %v481_v46 = vpop.f32.mrf.mxu0  ;;  %v496_v24 = vpop.f32.mrf.mxu1 }
  0xaf   : > { %v482_v47 = vadd.f32 %v481_v46, %v418_v45 }
  0xb1   : > { %v560_v48 = vrot.slane %v482_v47, 4 }
  0xb3   : > { %v561_v49 = vmax.f32 %v482_v47, %v560_v48 }
  0xb5   : > { %v562_v50 = vrot.slane %v561_v49, 2  ;;  %v671_v51 = vpop.f32.mrf.mxu2  ;;  %v1283_v27 = vpop.f32.mrf.mxu3 }
  0xb6   : > { %v672_v53 = vadd.f32 %v671_v51, %v418_v45  ;;  %v484_v54 = vpop.f32.mrf.mxu0  ;;  %v548_v42 = vpop.f32.mrf.mxu1 }
  0xb7   : > { %v563_v55 = vmax.f32 %v561_v49, %v562_v50  ;;  %v485_v56 = vadd.f32 %v484_v54, %v423_v52  ;;  %v428_v45 = vpop.permute.xlu1 %427  ;;  %v1298_v50 = vpop.permute.xlu2 %442 }
  0xb8   : > { %v718_v57 = vrot.slane %v672_v53, 4 }
  0xb9   : > { %v564_v58 = vrot.slane %v563_v55, 1  ;;  %v602_v59 = vrot.slane %v485_v56, 4 }
  0xba   : > { %v719_v60 = vmax.f32 %v672_v53, %v718_v57 }
  0xbb   : > { %v565_v61 = vmax.f32 %v563_v55, %v564_v58  ;;  %v603_v62 = vmax.f32 %v485_v56, %v602_v59  ;;  %v502_v59 = vpop.permute.xlu0 %501 }
  0xbc   : > { %v720_v63 = vrot.slane %v719_v60, 2 }
  0xbd   : > { %v566_v0 = vsub.f32 %v482_v47, %v565_v61  ;;  %v604_v1 = vrot.slane %v603_v62, 2  ;;  %v674_v2 = vpop.f32.mrf.mxu2  ;;  %v706_v49 = vpop.f32.mrf.mxu3 }
  0xbe   : > { %v721_v3 = vmax.f32 %v719_v60, %v720_v63  ;;  %v675_v4 = vadd.f32 %v674_v2, %v423_v52  ;;  %v487_v46 = vpop.f32.mrf.mxu0 }
  0xbf   : > { %v567_v5 = vmul.f32 1.442695, %v566_v0  ;;  %v605_v6 = vmax.f32 %v603_v62, %v604_v1  ;;  %v1307_v62 = vadd.f32 %v548_v42, %v502_v59 }
  0xc0   : > { %v722_v7 = vrot.slane %v721_v3, 1  ;;  %v761_v8 = vrot.slane %v675_v4, 4 }
  0xc1   : > { %1039 = vpow2.f32 %v567_v5  ;;  %v606_v9 = vrot.slane %v605_v6, 1  ;;  %v1309_v5 = vadd.f32 %v706_v49, %v502_v59 }
  0xc2   : > { %v723_v10 = vmax.f32 %v721_v3, %v722_v7  ;;  %v762_v11 = vmax.f32 %v675_v4, %v761_v8  ;;  %v551_v3 = vpop.f32.mrf.mxu1  ;;  %v488_v7 = vadd.f32 %v487_v46, %v428_v45 }
  0xc3   : > { %v607_v12 = vmax.f32 %v605_v6, %v606_v9  ;;  %v1312_v6 = vadd.f32 %v496_v24, %v1298_v50  ;;  %v433_v9 = vpop.permute.xlu1 %432 }
  0xc4   : > { %v724_v13 = vsub.f32 %v672_v53, %v723_v10  ;;  %v763_v14 = vrot.slane %v762_v11, 2 }
  0xc5   : > { %v608_v15 = vsub.f32 %v485_v56, %v607_v12  ;;  %v677_v56 = vpop.f32.mrf.mxu2 }
  0xc6   : > { %v725_v16 = vmul.f32 1.442695, %v724_v13  ;;  %v764_v17 = vmax.f32 %v762_v11, %v763_v14  ;;  %v1314_v8 = vadd.f32 %v677_v56, %v428_v45  ;;  %v490_v10 = vpop.f32.mrf.mxu0  ;;  %v709_v14 = vpop.f32.mrf.mxu3 }
  0xc7   : > { %v1279_v18 = vpop.eup %1039  ;;  %v609_v19 = vmul.f32 1.442695, %v608_v15  ;;  %v491_v15 = vadd.f32 %v490_v10, %v433_v9 }
  0xc8   : > { %v569_v20 = vrot.slane %v1279_v18, 4  ;;  %1041 = vpow2.f32 %v725_v16  ;;  %v765_v21 = vrot.slane %v764_v17, 1 }
  0xc9   : > { %1043 = vpow2.f32 %v609_v19 }
  0xca   : > { %v570_v22 = vadd.f32 %v1279_v18, %v569_v20  ;;  %v766_v23 = vmax.f32 %v764_v17, %v765_v21  ;;  %v554_v46 = vpop.f32.mrf.mxu1 }
  0xcc   : > { %v571_v25 = vrot.slane %v570_v22, 2  ;;  %v767_v26 = vsub.f32 %v675_v4, %v766_v23  ;;  %v507_v4 = vpop.permute.xlu2 %506 }
  0xcd   : > { %v552_v20 = vadd.f32 %v551_v3, %v507_v4  ;;  %v1320_v21 = vadd.f32 %v709_v14, %v507_v4 }
  0xce   : > { %v1287_v29 = vpop.eup %1041  ;;  %v572_v30 = vadd.f32 %v571_v25, %v570_v22  ;;  %v768_v31 = vmul.f32 1.442695, %v767_v26  ;;  %v712_v3 = vpop.f32.mrf.mxu3 }
  0xcf   : > { %v1289_v32 = vpop.eup %1043  ;;  %v727_v33 = vrot.slane %v1287_v29, 4  ;;  %v493_v10 = vpop.f32.mrf.mxu0 }
  0xd0   : > { %v573_v34 = vrot.slane %v572_v30, 1  ;;  %v611_v35 = vrot.slane %v1289_v32, 4  ;;  %1045 = vpow2.f32 %v768_v31  ;;  %v680_v31 = vpop.f32.mrf.mxu2 }
  0xd1   : > { %v728_v36 = vadd.f32 %v1287_v29, %v727_v33 }
  0xd2   : > { %v574_v37 = vadd.f32 %v573_v34, %v572_v30  ;;  %v612_v38 = vadd.f32 %v1289_v32, %v611_v35 }
  0xd3   : > { %v729_v39 = vrot.slane %v728_v36, 2 }
  0xd4   : > { %1047 = vrcp.f32 %v574_v37  ;;  %v613_v40 = vrot.slane %v612_v38, 2  ;;  %v586_v63 = vand.u32 2147483648, %v574_v37  ;;  %v584_v1 = vand.u32 2147483647, %v574_v37 }
  0xd5   : > { %v730_v41 = vadd.f32 %v729_v39, %v728_v36  ;;  %vm580_vm2 = vweird.f32 %v574_v37  ;;  %v681_v36 = vadd.f32 %v680_v31, %v433_v9 }
  0xd6   : > { %v1295_v43 = vpop.eup %1045  ;;  %v614_v44 = vadd.f32 %v613_v40, %v612_v38  ;;  %v587_v17 = vor.u32 1.1754944e-38, %v586_v63  ;;  %vm585_vm4 = vcmp.eq.f32.partialorder %v584_v1, 8.507059e+37 }
  0xd7   : > { %v731_v47 = vrot.slane %v730_v41, 1  ;;  %v770_v48 = vrot.slane %v1295_v43, 4 }
  0xd8   : > { %v615_v51 = vrot.slane %v614_v44, 1  ;;  %v683_v31 = vpop.f32.mrf.mxu2 }
  0xd9   : > { %v1300_v52 = vadd.f32 %v731_v47, %v730_v41  ;;  %v771_v53 = vadd.f32 %v1295_v43, %v770_v48 }
  0xda   : > { %v1048_v54 = vpop.eup %1047  ;;  %v1303_v55 = vadd.f32 %v615_v51, %v614_v44 }
  0xdb   : > { %1049 = vrcp.f32 %v1300_v52  ;;  %v576_v57 = vmul.f32 %v1048_v54, %v574_v37  ;;  %v772_v58 = vrot.slane %v771_v53, 2  ;;  %vm581_vm1 = vweird.f32 %v1048_v54 }
  0xdc   : > { %1051 = vrcp.f32 %v1303_v55  ;;  %vm582_vm3 = vmor %vm580_vm2, %vm581_vm1  ;;  %v742_v26 = vand.u32 2147483647, %v1300_v52  ;;  %v744_v30 = vand.u32 2147483648, %v1300_v52  ;;  %v626_v35 = vand.u32 2147483647, %v1303_v55 }
  0xdd   : > { %v577_v60 = vsub.f32 1.0, %v576_v57  ;;  %v773_v61 = vadd.f32 %v772_v58, %v771_v53  ;;  %vm738_vm5 = vweird.f32 %v1300_v52  ;;  %v628_v38 = vand.u32 2147483648, %v1303_v55 }
  0xde   : > { %vm622_vm7 = vweird.f32 %v1303_v55  ;;  %vm743_vm9 = vcmp.eq.f32.partialorder %v742_v26, 8.507059e+37  ;;  %v745_v42 = vor.u32 1.1754944e-38, %v744_v30  ;;  %vm627_vm11 = vcmp.eq.f32.partialorder %v626_v35, 8.507059e+37 }
  0xdf   : > { %v578_v0 = vmul.f32 %v1048_v54, %v577_v60  ;;  %v774_v2 = vrot.slane %v773_v61, 1  ;;  %v629_v51 = vor.u32 1.1754944e-38, %v628_v38  ;;  %v687_v38 = vadd.f32 %v1283_v27, %v1298_v50 }
  0xe1   : > { %v1050_v11 = vpop.eup %1049  ;;  %v579_v12 = vadd.f32 %v1048_v54, %v578_v0  ;;  %v1316_v13 = vadd.f32 %v774_v2, %v773_v61 }
  0xe2   : > { %v1052_v16 = vpop.eup %1051  ;;  %v734_v19 = vmul.f32 %v1050_v11, %v1300_v52  ;;  %vm739_vm6 = vweird.f32 %v1050_v11 }
  0xe3   : > { %v583_v22 = vsel %vm582_vm3, %v1048_v54, %v579_v12  ;;  %1053 = vrcp.f32 %v1316_v13  ;;  %v618_v23 = vmul.f32 %v1052_v16, %v1303_v55  ;;  %vm623_vm8 = vweird.f32 %v1052_v16  ;;  %vm740_vm10 = vmor %vm738_vm5, %vm739_vm6 }
  0xe4   : > { %v588_v24 = vsel %vm585_vm4, %v587_v17, %v583_v22  ;;  %v735_v25 = vsub.f32 1.0, %v734_v19  ;;  %vm624_vm12 = vmor %vm622_vm7, %vm623_vm8  ;;  %v785_v57 = vand.u32 2147483647, %v1316_v13  ;;  %v787_v55 = vand.u32 2147483648, %v1316_v13 }
  0xe5   : > { %v589_v33 = vmul.f32 %v1279_v18, %v588_v24  ;;  %v619_v34 = vsub.f32 1.0, %v618_v23  ;;  %vm781_vm14 = vweird.f32 %v1316_v13  ;;  %v494_v19 = vadd.f32 %v493_v10, %v1285_v28  ;;  %v512_v24 = vpop.permute.xlu1 %511 }
  0xe6   : > { %v736_v37 = vmul.f32 %v1050_v11, %v735_v25  ;;  %vm786_vm0 = vcmp.eq.f32.partialorder %v785_v57, 8.507059e+37 }
  0xe7   : > { %v620_v39 = vmul.f32 %v1052_v16, %v619_v34  ;;  %v590_v40 = vperm.slane %v589_v33, 0  ;;  %v592_v44 = vperm.slane %v589_v33, 1  ;;  %v595_v45 = vperm.slane %v589_v33, 2 }
  0xe8   : > { %v737_v41 = vadd.f32 %v1050_v11, %v736_v37  ;;  %v598_v58 = vperm.slane %v589_v33, 3 }
  0xe9   : > { %v1054_v18 = vpop.eup %1053  ;;  %v621_v47 = vadd.f32 %v1052_v16, %v620_v39  ;;  %v591_v48 = vmul.f32 %v590_v40, %v488_v7  ;;  %v593_v53 = vmul.f32 %v592_v44, %v491_v15  ;;  %v596_v0 = vmul.f32 %v595_v45, %v1307_v62 }
  0xea   : > { %v741_v49 = vsel %vm740_vm10, %v1050_v11, %v737_v41  ;;  %v777_v52 = vmul.f32 %v1054_v18, %v1316_v13  ;;  %vm782_vm13 = vweird.f32 %v1054_v18  ;;  %v599_v12 = vmul.f32 %v598_v58, %v552_v20  ;;  %v557_v20 = vpop.f32.mrf.mxu1 }
  0xeb   : > { %v746_v54 = vsel %vm743_vm9, %v745_v42, %v741_v49  ;;  %v625_v56 = vsel %vm624_vm12, %v1052_v16, %v621_v47  ;;  %v594_v63 = vadd.f32 %v593_v53, %v591_v48  ;;  %vm783_vm15 = vmor %vm781_vm14, %vm782_vm13  ;;  %v788_v16 = vor.u32 1.1754944e-38, %v787_v55  ;;  %v715_v47 = vpop.f32.mrf.mxu3 }
  0xec   : > { %v747_v59 = vmul.f32 %v1287_v29, %v746_v54  ;;  %v630_v60 = vsel %vm627_vm11, %v629_v51, %v625_v56  ;;  %v778_v61 = vsub.f32 1.0, %v777_v52  ;;  %v555_v39 = vadd.f32 %v554_v46, %v512_v24 }
  0xed   : > { %v631_v1 = vmul.f32 %v1289_v32, %v630_v60  ;;  %v597_v29 = vadd.f32 %v596_v0, %v594_v63  ;;  %v684_v42 = vadd.f32 %v683_v31, %v1285_v28  ;;  %v713_v48 = vadd.f32 %v712_v3, %v512_v24 }
  0xee   : > { %v753_v2 = vperm.slane %v747_v59, 2  ;;  %v779_v4 = vmul.f32 %v1054_v18, %v778_v61  ;;  %v748_v7 = vperm.slane %v747_v59, 0  ;;  %v750_v9 = vperm.slane %v747_v59, 1 }
  0xef   : > { %v634_v11 = vperm.slane %v631_v1, 1  ;;  %v756_v32 = vperm.slane %v747_v59, 3  ;;  %v600_v17 = vadd.f32 %v599_v12, %v597_v29  ;;  %v632_v25 = vperm.slane %v631_v1, 0 }
  0xf0   : > { %v780_v14 = vadd.f32 %v1054_v18, %v779_v4  ;;  %v749_v15 = vmul.f32 %v748_v7, %v1314_v8  ;;  %v751_v62 = vmul.f32 %v750_v9, %v681_v36  ;;  %v754_v22 = vmul.f32 %v753_v2, %v1309_v5  ;;  %v517_v36 = vpop.permute.xlu0 %516 }
  0xf1   : > { %v635_v8 = vmul.f32 %v634_v11, %v1312_v6  ;;  %601 = vst [vmem:[%s1346_s18] sm:$0xff] %v600_v17  ;;  %v637_v30 = vperm.slane %v631_v1, 2  ;;  %v757_v35 = vmul.f32 %v756_v32, %v1320_v21  ;;  %v633_v5 = vmul.f32 %v632_v25, %v494_v19 }
  0xf2   : > { %v784_v23 = vsel %vm783_vm15, %v1054_v18, %v780_v14  ;;  %v752_v13 = vadd.f32 %v751_v62, %v749_v15  ;;  %v640_v37 = vperm.slane %v631_v1, 3  ;;  %v558_v6 = vadd.f32 %v557_v20, %v517_v36 }
  0xf3   : > { %v789_v26 = vsel %vm786_vm0, %v788_v16, %v784_v23  ;;  %v638_v44 = vmul.f32 %v637_v30, %v555_v39  ;;  %v716_v50 = vadd.f32 %v715_v47, %v517_v36 }
  0xf4   : > { %v790_v33 = vmul.f32 %v1295_v43, %v789_v26  ;;  %v755_v34 = vadd.f32 %v754_v22, %v752_v13  ;;  %v636_v43 = vadd.f32 %v635_v8, %v633_v5  ;;  %v641_v49 = vmul.f32 %v640_v37, %v558_v6 }
  0xf6   : > { %v793_v40 = vperm.slane %v790_v33, 1  ;;  %v758_v41 = vadd.f32 %v757_v35, %v755_v34  ;;  %v796_v18 = vperm.slane %v790_v33, 2  ;;  %v791_v45 = vperm.slane %v790_v33, 0 }
  0xf7   : > { %v799_v51 = vperm.slane %v790_v33, 3  ;;  %v639_v52 = vadd.f32 %v638_v44, %v636_v43 }
  0xf8   : > { %v794_v21 = vmul.f32 %v793_v40, %v687_v38  ;;  %985 = vst [vmem:[%s1346_s18 + $0x10] sm:$0xff] %v758_v41  ;;  %v792_v27 = vmul.f32 %v791_v45, %v684_v42  ;;  %v797_v46 = vmul.f32 %v796_v18, %v713_v48  ;;  %v849_v58 = vld [vmem:[%s1346_s18] sm:$0xff] (%p1170_p6) }
  0xf9   : > { %v642_v53 = vadd.f32 %v641_v49, %v639_v52  ;;  %v800_v56 = vmul.f32 %v799_v51, %v716_v50  ;;  %850 = vst [vmem:[%s814_s27] sm:$0xff] (%p1170_p6), %v849_v58 }
  0xfa   : > { %v795_v54 = vadd.f32 %v794_v21, %v792_v27 }
  0xfb   : > { %643 = vst [vmem:[%s1346_s18 + $0x8] sm:$0xff] %v642_v53 }
  0xfc   : > { %v798_v28 = vadd.f32 %v797_v46, %v795_v54  ;;  %809 = sbr.rel (!%p1170_p6) target bundleno = 265 (0x109), region = 124 }
  0xfe   : > { %v801_v57 = vadd.f32 %v800_v56, %v798_v28 }
  0xff   : > { %v853_v60 = vld [vmem:[%s1346_s18 + $0x10] sm:$0xff] (%p1170_p6) }
 0x100   : > { %986 = vst [vmem:[%s1346_s18 + $0x18] sm:$0xff] %v801_v57 }
 0x101   : > { %854 = vst [vmem:[%s814_s27 + $0x20] sm:$0xff] %v853_v60 }
 0x102   : > { %v851_v59 = vld [vmem:[%s1346_s18 + $0x8] sm:$0xff] }
 0x103   : > { %852 = vst [vmem:[%s814_s27 + $0x10] sm:$0xff] %v851_v59 }
 0x107   : > { %v855_v61 = vld [vmem:[%s1346_s18 + $0x18] sm:$0xff] }
 0x108   : > { %856 = vst [vmem:[%s814_s27 + $0x30] sm:$0xff] %v855_v61 }
 0x109 PF: > { %s16_s25 = sadd.s32 1, %s1093_s25   ;;  %s1391_s21 = smov %s1081_s22 }
 0x10a   : > { %p13_p11 = scmp.ge.s32.totalorder %s16_s25, 4   ;;  %s1392_s22 = smov %s1175_s8 }
 0x10b   : > { %s1393_s23 = smov %s1089_s24  ;;  %s1394_s24 = smov %s1396_s26 }
 0x10c   :  { %15 = sbr.rel (!%p13_p11) target bundleno = 3 (0x3), region = 204 }

</bundles_post_ra>
